<compile_context>
chip_gen: v7x
topology: tpu7x:2x2x1
jax: 0.10.0
libtpu: 0.0.40
codegen_flags: <defaults>
</compile_context>

<pallas_src>
import math

import jax
import jax.numpy as jnp
from jax import lax
from jax.experimental import pallas as pl
from jax.experimental.pallas import tpu as pltpu


def _vmem_capacity_bytes(default=128 << 20):
    """Physical VMEM per TensorCore (generation aware), with a safe fallback."""
    try:
        info = pltpu.get_tpu_info()
        cap = getattr(info, "vmem_capacity_bytes", None)
        return int(cap) if cap else default
    except Exception:
        return default


def _pick_block_b(B, T, bytes_per_b, vmem_cap):
    """Batch elements per grid step.

    Bounded by (a) an MXU row-fill target (~256 rows per fused projection),
    (b) the O(T^2) per-batch-element resident intermediates vs. ~40% of VMEM,
    and constrained so the grid has >= 2 (preferably even) steps so the
    'parallel' axis can shard across v7x's two TensorCores.
    """
    row_target = max(1, -(-256 // T))
    vmem_target = max(1, int(0.4 * vmem_cap) // max(bytes_per_b, 1))
    target = max(1, min(row_target, vmem_target))
    divisors = [d for d in range(1, B + 1) if B % d == 0]
    cands = [d for d in divisors if d <= target] or [1]
    even_steps = [d for d in cands if (B // d) >= 2 and (B // d) % 2 == 0]
    multi_step = [d for d in cands if (B // d) >= 2]
    pool = even_steps or multi_step or cands
    return max(pool)


def _attention_body(x_ref, w_ref, mask_ref, o_ref, *, Hp, QKP, compute_dtype,
                    approx_recip):
    """One grid step: `Bb` batch elements of single-head causal attention.

    x_ref:    (Bb, T, C)          activations, already in compute_dtype
    w_ref:    (C, Hp + 2*QKP)     fused [Wv->Hp | Wq*scale->QKP | Wk->QKP]
    mask_ref: (1 or Bb, T, T) int8 or None; causal tril pre-fused (0 == masked)
    o_ref:    (Bb, T, Hp)         lane-dense (Hp % 128 == 0) output slab
    """
    Bb, T, C = x_ref.shape

    # Single fused QKV projection on the MXU; result pops in compute_dtype
    # (f32 accumulation happens inside the MXU regardless).
    x2d = x_ref[...].reshape(Bb * T, C)
    qkv = jnp.dot(x2d, w_ref[...], preferred_element_type=compute_dtype)

    # All slice starts are multiples of 128 -> no lane-offset relayouts.
    v = qkv[:, :Hp].reshape(Bb, T, Hp)
    q = qkv[:, Hp:Hp + QKP].reshape(Bb, T, QKP)          # scale pre-baked
    k = qkv[:, Hp + QKP:Hp + 2 * QKP].reshape(Bb, T, QKP)

    # Scores: contract the head dim directly (no k.T / XLU transpose); the
    # zero-padded q/k columns contribute exactly zero.
    wei = jnp.einsum("bqd,bkd->bqk", q, k,
                     preferred_element_type=jnp.float32)  # (Bb, T, T) f32

    if mask_ref is not None:
        # Causal tril already fused into the user mask in the wrapper.
        valid = mask_ref[...] != 0                         # (1|Bb, T, T) bool
    else:
        row = lax.broadcasted_iota(jnp.int32, (T, T), 0)
        col = lax.broadcasted_iota(jnp.int32, (T, T), 1)
        valid = (col <= row)[None]                         # (1, T, T) bool
    wei = jnp.where(valid, wei, -jnp.inf)

    # Numerically-stable softmax, kept in f32 on the VPU/EUP.
    m = jnp.max(wei, axis=-1, keepdims=True)
    e = jnp.exp(wei - m)
    s = jnp.sum(e, axis=-1, keepdims=True)
    if approx_recip:
        p = e * pl.reciprocal(s, approx=True)   # EUP slot; essentially free
    else:
        p = e / s                               # exact path for f32 checking

    # TODO(synk): nn.Dropout(dropout) is identity for dropout=0.0 / eval mode.

    out = jnp.einsum("bqk,bkd->bqd", p.astype(compute_dtype), v,
                     preferred_element_type=o_ref.dtype)   # (Bb, T, Hp)
    o_ref[...] = out.astype(o_ref.dtype)


def masked_attention_head(x, w_key, w_query, w_value, mask=None, *,
                          compute_dtype=jnp.bfloat16, block_b=None,
                          unpad_output=True):
    """Pallas forward of MaskedAttentionHead.

    x: (B, T, C) f32; w_*: (C, H) so k = x @ w_key (== nn.Linear(C,H,bias=False));
    mask: optional, broadcastable to (B, T, T), 0 == masked out.
    Output dtype follows compute_dtype (bf16 on the performance path).
    """
    B, T, C = x.shape
    H = w_key.shape[1]
    compute_dtype = jnp.dtype(compute_dtype)
    exact = compute_dtype == jnp.dtype(jnp.float32)

    Hp = QKP = ((H + 127) // 128) * 128     # lane-dense segment widths
    Wtot = Hp + 2 * QKP
    scale = float(H) ** -0.5

    def _pad_cols(w, width):
        return w if w.shape[1] == width else jnp.pad(w, ((0, 0), (0, width - w.shape[1])))

    # Fused, pre-scaled weight slab with every segment 128-lane aligned:
    # [Wv -> Hp | Wq*scale -> QKP | Wk -> QKP].
    w_v = _pad_cols(w_value.astype(compute_dtype), Hp)
    w_q = _pad_cols((w_query.astype(jnp.float32) * scale).astype(compute_dtype), QKP)
    w_k = _pad_cols(w_key.astype(compute_dtype), QKP)
    w_qkv = jnp.concatenate([w_v, w_q, w_k], axis=1)        # (C, Wtot)

    # Stream activations in compute_dtype (halves input DMA on the bf16 path).
    x_in = x.astype(compute_dtype)

    # User mask: keep natural batch extent (1 or B), pre-fuse the causal tril,
    # stream as int8.  Fully-masked rows yield NaN, matching the PyTorch ref.
    has_mask = mask is not None
    mask_arr = None
    mB = 0
    if has_mask:
        m = jnp.asarray(mask) != 0
        while m.ndim < 3:
            m = m[None]
        m = jnp.broadcast_to(m, jnp.broadcast_shapes(m.shape, (1, T, T)))
        if m.shape[0] not in (1, B):
            m = jnp.broadcast_to(m, (B, T, T))
        tril = jnp.tril(jnp.ones((T, T), dtype=bool))
        mask_arr = jnp.logical_and(m, tril[None]).astype(jnp.int8)
        mB = mask_arr.shape[0]

    # --- block_b selection & generation-aware VMEM budget -------------------
    vmem_cap = _vmem_capacity_bytes()
    cbytes = compute_dtype.itemsize
    bytes_per_b = (4 * T * T * 4                    # wei / exp / prob f32 copies
                   + T * Wtot * cbytes              # fused qkv rows
                   + T * Hp * (4 + cbytes)          # second-matmul temporaries
                   + (T * T if has_mask else 0))    # int8 mask block
    if block_b is None:
        block_b = _pick_block_b(B, T, bytes_per_b, vmem_cap)
    assert B % block_b == 0
    nb = B // block_b

    mask_block_rows = (1 if mB == 1 else block_b) if has_mask else 0
    block_bytes = (2 * block_b * T * C * cbytes           # x blocks (compute_dtype)
                   + 2 * C * Wtot * cbytes                # fused weight slab
                   + 2 * block_b * T * Hp * cbytes        # output blocks
                   + 2 * mask_block_rows * T * T)         # int8 mask blocks
    interm_bytes = block_b * bytes_per_b + T * T * 8      # + causal iota/compare
    vmem_limit = int(min(int(0.8 * vmem_cap),             # headroom, esp. v7x
                         max(32 << 20, 2 * (block_bytes + interm_bytes))))

    # --- kernel / specs ------------------------------------------------------
    kern_kwargs = dict(Hp=Hp, QKP=QKP, compute_dtype=compute_dtype,
                       approx_recip=not exact)
    if has_mask:
        def kernel(x_ref, w_ref, m_ref, o_ref):
            _attention_body(x_ref, w_ref, m_ref, o_ref, **kern_kwargs)
    else:
        def kernel(x_ref, w_ref, o_ref):
            _attention_body(x_ref, w_ref, None, o_ref, **kern_kwargs)

    in_specs = [
        pl.BlockSpec((block_b, T, C), lambda b: (b, 0, 0)),
        # Grid-invariant weight slab (could be single-buffered via
        # pipeline_mode=pl.Buffered(1); negligible at these sizes, so the
        # portable default double-buffering is kept).
        pl.BlockSpec((C, Wtot), lambda b: (0, 0)),
    ]
    args = [x_in, w_qkv]
    if has_mask:
        if mB == 1:
            in_specs.append(pl.BlockSpec((1, T, T), lambda b: (0, 0, 0)))
        else:
            in_specs.append(pl.BlockSpec((block_b, T, T), lambda b: (b, 0, 0)))
        args.append(mask_arr)

    out = pl.pallas_call(
        kernel,
        out_shape=jax.ShapeDtypeStruct((B, T, Hp), compute_dtype),
        grid=(nb,),
        in_specs=in_specs,
        out_specs=pl.BlockSpec((block_b, T, Hp), lambda b: (b, 0, 0)),
        compiler_params=pltpu.CompilerParams(
            dimension_semantics=("parallel",),
            vmem_limit_bytes=vmem_limit,
        ),
    )(*args)

    # TODO(synk): for large T the O(T^2)-resident score block should become a
    # flash-style (q-tile, kv-tile) online-softmax grid (an 'arbitrary' kv axis
    # with m/l/acc VMEM scratch); the module's small block_size regime keeps
    # the resident form here (hits v7x's 64 MiB first, ~T >= 1k).
    if unpad_output and Hp != H:
        out = out[:, :, :H]
    return out


def _reference(x, w_key, w_query, w_value, mask=None):
    """Pure-JAX reference matching the PyTorch forward semantics (f32-exact)."""
    hi = lax.Precision.HIGHEST
    B, T, C = x.shape
    k = jnp.matmul(x, w_key, precision=hi)
    q = jnp.matmul(x, w_query, precision=hi)
    v = jnp.matmul(x, w_value, precision=hi)
    wei = jnp.matmul(q, jnp.swapaxes(k, -2, -1), precision=hi) * (k.shape[-1] ** -0.5)
    tril = jnp.tril(jnp.ones((T, T), dtype=jnp.float32))
    wei = jnp.where(tril == 0, -jnp.inf, wei)
    if mask is not None:
        wei = jnp.where(mask == 0, -jnp.inf, wei)
    wei = jax.nn.softmax(wei, axis=-1)
    return jnp.matmul(wei, v, precision=hi)


if __name__ == "__main__":
    # Module hyper-parameters (small, consistent with the forward pass).
    B, T = 2, 8           # batch, sequence length (T <= block_size)
    n_embd = 32           # C
    head_size = 16        # H

    key = jax.random.PRNGKey(0)
    kx, kk, kq, kv, km, km2 = jax.random.split(key, 6)

    x = jax.random.normal(kx, (B, T, n_embd), dtype=jnp.float32)

    bound = 1.0 / math.sqrt(n_embd)
    w_key = jax.random.uniform(kk, (n_embd, head_size), jnp.float32, -bound, bound)
    w_query = jax.random.uniform(kq, (n_embd, head_size), jnp.float32, -bound, bound)
    w_value = jax.random.uniform(kv, (n_embd, head_size), jnp.float32, -bound, bound)

    # User masks with the diagonal kept valid so no query row is fully masked
    # (fully-masked rows are NaN in the PyTorch reference as well).
    rand_mask = jax.random.uniform(km, (B, T, T)) > 0.3
    mask = jnp.logical_or(rand_mask, jnp.eye(T, dtype=bool)[None]).astype(jnp.int32)
    mask2d = jnp.logical_or(jax.random.uniform(km2, (T, T)) > 0.3,
                            jnp.eye(T, dtype=bool))          # batch-invariant mask

    ref_nomask = _reference(x, w_key, w_query, w_value, mask=None)
    ref_mask = _reference(x, w_key, w_query, w_value, mask=mask)
    ref_mask2d = _reference(x, w_key, w_query, w_value, mask=mask2d[None])

    # f32-precision path — tight check, with and without mask.
    out = jax.block_until_ready(
        masked_attention_head(x, w_key, w_query, w_value, mask=None,
                              compute_dtype=jnp.float32))
    assert out.shape == (B, T, head_size)
    assert jnp.allclose(out, ref_nomask, atol=5e-3, rtol=5e-3), "f32/no-mask mismatch"

    out_m = jax.block_until_ready(
        masked_attention_head(x, w_key, w_query, w_value, mask=mask,
                              compute_dtype=jnp.float32))
    assert jnp.allclose(out_m, ref_mask, atol=5e-3, rtol=5e-3), "f32/mask mismatch"

    # Performance path (bf16 streaming/matmuls, f32 softmax, bf16 output).
    out_bf16 = jax.block_until_ready(
        masked_attention_head(x, w_key, w_query, w_value, mask=mask))
    assert out_bf16.shape == (B, T, head_size)
    assert jnp.allclose(out_bf16.astype(jnp.float32), ref_mask,
                        atol=5e-2, rtol=5e-2), "bf16/mask mismatch"

    # Performance path with a batch-invariant (T, T) mask (exercises the
    # (1, T, T) mask BlockSpec that avoids any B-times mask materialization).
    out_bf16_2d = jax.block_until_ready(
        masked_attention_head(x, w_key, w_query, w_value, mask=mask2d))
    assert jnp.allclose(out_bf16_2d.astype(jnp.float32), ref_mask2d,
                        atol=5e-2, rtol=5e-2), "bf16/batch-invariant-mask mismatch"

    print("KERNEL_OK")
</pallas_src>

<mosaic_0001>
module attributes {stable_mosaic.version = 11 : i64} {
  func.func @kernel(%arg0: i32, %arg1: memref<1x8x32xf32, #tpu.memory_space<vmem>>, %arg2: memref<32x384xf32, #tpu.memory_space<vmem>>, %arg3: memref<1x8x128xf32, #tpu.memory_space<vmem>>) attributes {dimension_semantics = [#tpu.dimension_semantics<parallel>], iteration_bounds = array<i64: 2>, scalar_prefetch = 0 : i64, scratch_operands = 0 : i64, tpu.core_type = #tpu.core_type<tc>, window_params = [{transform_indices = @transform_0, window_bounds = array<i64: 1, 8, 32>}, {pipeline_mode = #tpu.pipeline_mode<synchronous>, transform_indices = @transform_1, window_bounds = array<i64: 32, 384>}, {transform_indices = @transform_2, window_bounds = array<i64: 1, 8, 128>}]} {
    %c0 = arith.constant 0 : index
    %c0_0 = arith.constant 0 : index
    %c0_1 = arith.constant 0 : index
    %0 = vector.load %arg1[%c0, %c0_0, %c0_1] : memref<1x8x32xf32, #tpu.memory_space<vmem>>, vector<1x8x32xf32>
    %1 = vector.shape_cast %0 : vector<1x8x32xf32> to vector<8x32xf32>
    %c0_2 = arith.constant 0 : index
    %c0_3 = arith.constant 0 : index
    %2 = vector.load %arg2[%c0_2, %c0_3] : memref<32x384xf32, #tpu.memory_space<vmem>>, vector<32x384xf32>
    %cst = arith.constant dense<0.000000e+00> : vector<8x384xf32>
    %3 = tpu.matmul %1, %2, %cst {dimension_numbers = #tpu.dot_dimension_numbers<[1], [0], [0], [1], [0, 0, 1, 1], [], []>} : vector<8x32xf32>, vector<32x384xf32>, vector<8x384xf32> -> vector<8x384xf32>
    %4 = vector.extract_strided_slice %3 {offsets = [0, 0], sizes = [8, 128], strides = [1, 1]} : vector<8x384xf32> to vector<8x128xf32>
    %5 = vector.shape_cast %4 : vector<8x128xf32> to vector<1x8x128xf32>
    %6 = vector.extract_strided_slice %3 {offsets = [0, 128], sizes = [8, 128], strides = [1, 1]} : vector<8x384xf32> to vector<8x128xf32>
    %7 = vector.shape_cast %6 : vector<8x128xf32> to vector<1x8x128xf32>
    %8 = vector.extract_strided_slice %3 {offsets = [0, 256], sizes = [8, 128], strides = [1, 1]} : vector<8x384xf32> to vector<8x128xf32>
    %9 = vector.shape_cast %8 : vector<8x128xf32> to vector<1x8x128xf32>
    "tpu.trace_start"() <{level = 10 : i32, message = "bqd,bkd->bqk"}> : () -> ()
    %cst_4 = arith.constant dense<0.000000e+00> : vector<1x8x8xf32>
    %10 = tpu.matmul %7, %9, %cst_4 {dimension_numbers = #tpu.dot_dimension_numbers<[2], [2], [1], [1], [0, 0, 0, 1, 1, 1], [0], [0]>} : vector<1x8x128xf32>, vector<1x8x128xf32>, vector<1x8x8xf32> -> vector<1x8x8xf32>
    "tpu.trace_stop"() : () -> ()
    %11 = tpu.iota {dimensions = array<i32: 0>} : vector<8x8xi32>
    %12 = tpu.iota {dimensions = array<i32: 1>} : vector<8x8xi32>
    %13 = arith.cmpi sle, %12, %11 : vector<8x8xi32>
    %14 = vector.shape_cast %13 : vector<8x8xi1> to vector<1x8x8xi1>
    %cst_5 = arith.constant 0xFF800000 : f32
    %15 = vector.broadcast %cst_5 : f32 to vector<1x8x8xf32>
    %16 = arith.select %14, %10, %15 : vector<1x8x8xi1>, vector<1x8x8xf32>
    %cst_6 = arith.constant dense<0xFF800000> : vector<1x8xf32>
    %17 = vector.multi_reduction <maximumf>, %16, %cst_6 [2] : vector<1x8x8xf32> to vector<1x8xf32>
    %18 = vector.shape_cast %17 : vector<1x8xf32> to vector<1x8x1xf32>
    %19 = vector.broadcast %18 : vector<1x8x1xf32> to vector<1x8x8xf32>
    %20 = arith.subf %16, %19 : vector<1x8x8xf32>
    %21 = math.exp %20 : vector<1x8x8xf32>
    %cst_7 = arith.constant dense<0.000000e+00> : vector<1x8xf32>
    %22 = vector.multi_reduction <add>, %21, %cst_7 [2] : vector<1x8x8xf32> to vector<1x8xf32>
    %23 = vector.shape_cast %22 : vector<1x8xf32> to vector<1x8x1xf32>
    %24 = vector.broadcast %23 : vector<1x8x1xf32> to vector<1x8x8xf32>
    %25 = arith.divf %21, %24 : vector<1x8x8xf32>
    "tpu.trace_start"() <{level = 10 : i32, message = "bqk,bkd->bqd"}> : () -> ()
    %cst_8 = arith.constant dense<0.000000e+00> : vector<1x8x128xf32>
    %26 = tpu.matmul %25, %5, %cst_8 {dimension_numbers = #tpu.dot_dimension_numbers<[2], [1], [1], [2], [0, 0, 0, 1, 1, 2], [0], [0]>} : vector<1x8x8xf32>, vector<1x8x128xf32>, vector<1x8x128xf32> -> vector<1x8x128xf32>
    "tpu.trace_stop"() : () -> ()
    %c0_9 = arith.constant 0 : index
    %c0_10 = arith.constant 0 : index
    %c0_11 = arith.constant 0 : index
    %27 = vector.load %arg3[%c0_9, %c0_10, %c0_11] : memref<1x8x128xf32, #tpu.memory_space<vmem>>, vector<1x8x128xf32>
    tpu.vector_store %arg3[%c0_9, %c0_10, %c0_11], %26 {strides = array<i32>} : memref<1x8x128xf32, #tpu.memory_space<vmem>>, vector<1x8x128xf32>,
    return
  }
  func.func @transform_0(%arg0: i32) -> (i32, i32, i32) {
    %c0_i32 = arith.constant 0 : i32
    %c0_i32_0 = arith.constant 0 : i32
    %c0_i32_1 = arith.constant 0 : i32
    return %arg0, %c0_i32, %c0_i32_0 : i32, i32, i32
  }
  func.func @transform_1(%arg0: i32) -> (i32, i32) {
    %c0_i32 = arith.constant 0 : i32
    %c0_i32_0 = arith.constant 0 : i32
    %c0_i32_1 = arith.constant 0 : i32
    return %c0_i32, %c0_i32_0 : i32, i32
  }
  func.func @transform_2(%arg0: i32) -> (i32, i32, i32) {
    %c0_i32 = arith.constant 0 : i32
    %c0_i32_0 = arith.constant 0 : i32
    %c0_i32_1 = arith.constant 0 : i32
    return %arg0, %c0_i32, %c0_i32_0 : i32, i32, i32
  }
}

</mosaic_0001>

<bundles_post_ra>
// kernel: tpu_custom_call.1
= control target key start
LH: loop header
LB: loop body
LE: loop exit
PB: predicated region body
PF: predicated region fallthrough
CT: control target
= control target key end

     0   :  { %7 = vsyncpa [#allocation3], 0  ;;  %s1077_s0 = inlined_call_operand.hbm [shape: f32[2,8,32], index: 0, kind: input, shape index: {}]   ;;  %s1078_s1 = inlined_call_operand.hbm [shape: f32[32,384], index: 1, kind: input, shape index: {}]   ;;  %s1079_s2 = inlined_call_operand.hbm [shape: f32[2,8,128], index: 2, kind: output, shape index: {}]  }
   0x1   :  { %9 = vsyncpa [#allocation3 + $0x1], 0 }
   0x2   :  { %10 = vsyncpa [#allocation6], 0 }
   0x3   :  { %11 = vsyncpa [#allocation4], 0 }
   0x4   :  { %13 = vsyncpa [#allocation4 + $0x1], 0  ;;  %s868_s9 = smov 0   ;;  %s870_s10 = smov 0  }
   0x5   :  { %s872_s11 = smov 0   ;;  %s874_s12 = smov 0  }
   0x6 LB: > { %s889_s13 = sadd.s32 4294967295, %s843_s12   ;;  %s588_s14 = sadd.s32 4294967294, %s843_s12   ;;  %s843_s12 = sphi %s874_s12, %s1099_s12   ;;  %s839_s11 = sphi %s872_s11, %s1098_s11   ;;  %s835_s10 = sphi %s870_s10, %s1097_s10   ;;  %s831_s9 = sphi %s868_s9, %s1096_s9  }
   0x7   : > { %p39_p0 = scmp.ne.s32.totalorder %s835_s10, %s831_s9  ;;  %p1080_p1 = scmp.eq.s32.totalorder %s889_s13, 0 }
   0x8   : > { %p90_p3 = scmp.eq.s32.totalorder %s588_s14, 1  ;;  %p589_p5 = scmp.ge.s32.totalorder %s843_s12, 1 }
   0x9   : > { %p898_p4 = por %p1080_p1, %p39_p0  ;;  %p97_p7 = scmp.lt.s32.totalorder %s843_s12, 3 }
   0xa   : > { %p903_p6 = por %p90_p3, %p39_p0  ;;  %s845_s18 = smov [#allocation5]  }
   0xb   : > { %s1083_s15 = scalar_select %p898_p4, 1, 0 }
   0xc   : > { %s1084_s16 = scalar_select %p903_p6, 1, 0 }
   0xd   : > { %p908_p8 = pnand %p589_p5, %p97_p7  ;;  %s109_s19 = sshll.u32 %s845_s18, 4  ;;  %s912_s19 = int_to_ptr.vmem [resolvable:$true] %s109_s19 }
   0xe   : > { %s924_s21 = sadd.s32 1, %s843_s12   ;;  %s26_s22 = sadd.s32 1, %s839_s11 }
   0xf   : > { %s1085_s17 = scalar_select %p908_p8, 1, 0 }
  0x10   : > { %p657_p9 = pneg %p908_p8  ;;  %s23_s23 = ssub.s32 %s843_s12, %s924_s21 }
  0x11   : > { %s715_s26 = scalar_lea.hbm %s1078_s1, 1536 }
  0x12   : > { %p919_p11 = pnand %p657_p9, %p1080_p1  ;;  %p716_p12 = scmp.ne.s32.totalorder %s1078_s1, %s715_s26 }
  0x13   : > { %p722_p5 = scmp.lt.u32.totalorder %s715_s26, %s1078_s1 }
  0x14   : > { %p717_p13 = pneg %p919_p11 }
  0x16   : > { %p718_p0 = pnand %p717_p13, %p716_p12 }
  0x18   : > { %p719_p3 = pneg %p718_p0 }
  0x1a   : > { %p724_p7 = pnand %p722_p5, %p719_p3 }
  0x1c   : > { %727 = shalt.err (!%p724_p7)
}
  0x1d   : > { %s728_s3 = scalar_lea.vmem %s912_s19, 1536  ;;  %p736_p2 = scmp.lt.s32.totalorder %s912_s19, %s912_s19 }
  0x1e   : > { %p729_p9 = scmp.ne.s32.totalorder %s912_s19, %s728_s3  ;;  %p737_p6 = scmp.lt.s32.totalorder %s728_s3, %s728_s3 }
  0x20   : > { %p731_p10 = pnand %p729_p9, %p717_p13  ;;  %p738_p4 = por %p737_p6, %p736_p2 }
  0x22   : > { %p732_p1 = pneg %p731_p10 }
  0x24   : > { %p739_p8 = pnand %p738_p4, %p732_p1 }
  0x26   : > { %742 = shalt.err (!%p739_p8)
}
  0x27   : > { %s846_s4 = smov 384   ;;  %s847_s5 = smov 24  }
  0x28   : > { %660 = dma.hbm_to_vmem [thread:$0]  (!%p919_p11), %s1078_s1, 1536, %s912_s19, [#allocation6], %s846_s4, %s846_s4, %s847_s5  }
  0x29   : > { %p24_p2 = scmp.eq.s32.totalorder %s23_s23, 0  ;;  %p33_p1 = scmp.ne.s32.totalorder %s839_s11, %s835_s10 }
  0x2a   : > { %p34_p4 = scmp.eq.s32.totalorder %s843_s12, 0  ;;  %p670_p6 = scmp.lt.s32.totalorder %s843_s12, 2 }
  0x2b   : > { %s955_s8 = scalar_select %p24_p2, %s839_s11, %s26_s22  }
  0x2c   : > { %p35_p8 = por %p34_p4, %p33_p1  ;;  %p1087_p10 = scmp.eq.s32.totalorder %s889_s13, 1 }
  0x2d   : > { %s123_s18 = sand.u32 1, %s839_s11   ;;  %s593_s24 = sshll.u32 %s843_s12, 7 }
  0x2e   : > { %p959_p12 = por %p1087_p10, %p33_p1  ;;  %s592_s25 = sshll.u32 %s123_s18, 3 }
  0x2f   : > { %s968_s27 = scalar_lea.hbm %s1077_s0, %s593_s24  ;;  %s127_s19 = scalar_lea.vmem [#allocation2], %s592_s25 }
  0x30   : > { %s134_s22 = sshll.u32 %s127_s19, 4  ;;  %p970_p11 = pnand %p670_p6, %p35_p8  ;;  %s974_s22 = int_to_ptr.vmem [resolvable:$true] %s134_s22 }
  0x31   : > { %s124_s28 = scalar_lea.sflag [#allocation3], %s123_s18  ;;  %s743_s29 = scalar_lea.hbm %s968_s27, 128 }
  0x32   : > { %p744_p13 = scmp.ne.s32.totalorder %s968_s27, %s743_s29  ;;  %p745_p0 = pneg %p970_p11 }
  0x33   : > { %s748_s4 = scalar_lea.hbm %s1077_s0, 256  ;;  %p749_p7 = scmp.lt.u32.totalorder %s968_s27, %s1077_s0 }
  0x34   : > { %p746_p3 = pnand %p745_p0, %p744_p13  ;;  %p750_p9 = scmp.lt.u32.totalorder %s748_s4, %s743_s29 }
  0x35   : > { %p752_p1 = scmp.lt.u32.totalorder %s743_s29, %s968_s27 }
  0x36   : > { %p747_p5 = pneg %p746_p3  ;;  %p751_p2 = por %p750_p9, %p749_p7 }
  0x38   : > { %p753_p4 = por %p752_p1, %p751_p2 }
  0x3a   : > { %p754_p6 = pnand %p753_p4, %p747_p5 }
  0x3c   : > { %757 = shalt.err (!%p754_p6)
}
  0x3d   : > { %s758_s7 = scalar_lea.vmem %s974_s22, 128  ;;  %s848_s18 = smov [#allocation2]  }
  0x3e   : > { %p759_p8 = scmp.ne.s32.totalorder %s974_s22, %s758_s7  ;;  %s763_s24 = sshll.u32 %s848_s18, 4  ;;  %s764_s24 = int_to_ptr.vmem [resolvable:$false] %s763_s24 }
  0x3f   : > { %s765_s25 = scalar_lea.vmem %s764_s24, 256  ;;  %p766_p3 = scmp.lt.s32.totalorder %s974_s22, %s764_s24 }
  0x40   : > { %p761_p10 = pnand %p759_p8, %p745_p0  ;;  %p767_p7 = scmp.lt.s32.totalorder %s765_s25, %s758_s7 }
  0x42   : > { %p762_p13 = pneg %p761_p10  ;;  %p768_p9 = por %p767_p7, %p766_p3 }
  0x44   : > { %p769_p2 = pnand %p768_p9, %p762_p13 }
  0x46   : > { %772 = shalt.err (!%p769_p2)
}
  0x47   : > { %664 = dma.hbm_to_vmem [thread:$0]  (!%p970_p11), %s968_s27, 128, %s974_s22, %s124_s28  }
  0x48   : > { %p1090_p5 = scmp.ne.s32.totalorder %s1085_s17, 0 }
  0x49   : > { %s1004_s20 = sand.u32 (!%p1090_p5), 1, %s835_s10   ;;  %p1091_p0 = scmp.ne.s32.totalorder (!%p1090_p5), %s1083_s15, 0 }
  0x4a   : > { %143 = sbr.rel (%p1090_p5) target bundleno = 1063 (0x427), region = 28  ;;  %s595_s26 = sshll.u32 (!%p1090_p5), %s1004_s20, 3 }
  0x4b   : > { %s146_s19 = scalar_lea.sflag (!%p1090_p5), [#allocation3], %s1004_s20  ;;  %s1010_s29 = scalar_lea.vmem (!%p1090_p5), [#allocation2], %s595_s26 }
  0x51   : > { %818 = dma.done.wait (%p1091_p0), %s146_s19, 128  }
  0x52   : > { %820 = vsyncadd (%p1091_p0), %s146_s19, 4294967168  ;;  %p1092_p11 = scmp.eq.s32.totalorder %s889_s13, 0 }
  0x54   : > { %822 = dma.done.wait (%p1092_p11), [#allocation6], 1536   ;;  %p1093_p1 = pmov %p1092_p11 }
  0x55   : > { %v849_v0 = vmov 0.0|0.0   ;;  %vm850_vm0 = vmmov 0   ;;  %v851_v1 = vmov 0.0   ;;  %v177_v2 = vld [vmem:[#allocation5 + $0x10] sm:$0xff]  ;;  %v180_v3 = vld [vmem:[#allocation5 + $0x28] sm:$0xff]  ;;  %v179_v6 = vld [vmem:[#allocation5 + $0x20] sm:$0xff]  ;;  %v402_v25 = vlaneseq }
  0x56   : > { %824 = vsyncadd (%p1093_p1), [#allocation6], 4294965760  ;;  %643 = vmatprep.subr.bf16.mxu1 %v849_v0  ;;  %622 = vmatprep.mubr.msk.f32.mxu1 %vm850_vm0, %v851_v1  ;;  %v176_v4 = vld [vmem:[#allocation5 + $0x8] sm:$0xff]  ;;  %v644_v5 = vpack.c.bf16 %v180_v3, %v177_v2  ;;  %v175_v7 = vld [vmem:[#allocation5] sm:$0xff]  ;;  %vm187_vm1 = vcmask 261120   ;;  %vm408_vm3 = vcmask 64512  }
  0x57   : > { %255 = vmatprep.mubr.f32.mxu0 %v851_v1  ;;  %v178_v8 = vld [vmem:[#allocation5 + $0x18] sm:$0xff]  ;;  %v635_v9 = vpack.c.bf16 %v179_v6, %v176_v4  ;;  %v183_v11 = vld [vmem:[#allocation5 + $0x40] sm:$0xff]  ;;  %v185_v15 = vld [vmem:[#allocation5 + $0x50] sm:$0xff]  ;;  %v403_v26 = vshrl.u32 %v402_v25, 7  ;;  %v405_v27 = vand.u32 127, %v402_v25  ;;  %s173_s15 = scalar_lea.vmem [#allocation7], %s595_s26 }
  0x58   : > { %v637_v10 = vpack.c.bf16 %v178_v8, %v175_v7  ;;  %v186_v12 = vld [vmem:[#allocation5 + $0x58] sm:$0xff]  ;;  %645 = vmatpush3.bf16.msra.mxu1 %v644_v5  ;;  %v181_v16 = vld [vmem:[#allocation5 + $0x30] sm:$0xff]  ;;  %v184_v17 = vld [vmem:[#allocation5 + $0x48] sm:$0xff]  ;;  %s508_s17 = sshll.u32 %s173_s15, 4  ;;  %s602_s27 = sshll.u32 %s889_s13, 7  ;;  %s1030_s17 = int_to_ptr.vmem [resolvable:$true] %s508_s17 }
  0x59   : > { %v182_v13 = vld [vmem:[#allocation5 + $0x38] sm:$0xff]  ;;  %v647_v14 = vpack.c.bf16 %v186_v12, %v183_v11  ;;  %636 = vmatprep.subr.bf16.mxu0 %v635_v9  ;;  %646 = vmatprep.subr.bf16.mxu1 %v849_v0  ;;  %v641_v19 = vpack.c.bf16 %v184_v17, %v181_v16  ;;  %vm406_vm2 = vcmp.le.s32.totalorder %v405_v27, %v403_v26  ;;  %s1035_s28 = scalar_lea.hbm %s1079_s2, %s602_s27  ;;  %s495_s30 = scalar_lea.sflag [#allocation4], %s1004_s20 }
  0x5a   : > { %v639_v18 = vpack.c.bf16 %v185_v15, %v182_v13  ;;  %638 = vmatpush1.bf16.msra.mxu0 %v637_v10  ;;  %v174_v20 = vld [vmem:[%s1010_s29] sm:$0xff]  ;;  %s773_s3 = scalar_lea.vmem %s1030_s17, 128  ;;  %s852_s13 = smov [#allocation7]  }
  0x5b   : > { %p774_p4 = scmp.ne.s32.totalorder %s1030_s17, %s773_s3  ;;  %s777_s4 = sshll.u32 %s852_s13, 4  ;;  %s778_s4 = int_to_ptr.vmem [resolvable:$false] %s777_s4 }
  0x5c   : > { %640 = vmatprep.subr.bf16.mxu0 %v639_v18  ;;  %648 = vmatpush3.bf16.msra.mxu1 %v647_v14  ;;  %s779_s5 = scalar_lea.vmem %s778_s4, 256  ;;  %p780_p10 = scmp.lt.s32.totalorder %s1030_s17, %s778_s4 }
  0x5d   : > { %630 = vmatprep.subr.mxu1 %v851_v1  ;;  %p775_p6 = pnand %p774_p4, %p959_p12  ;;  %p781_p13 = scmp.lt.s32.totalorder %s779_s5, %s773_s3 }
  0x5e   : > { %642 = vmatpush1.bf16.msra.mxu0 %v641_v19 }
  0x5f   : > { %623 = vmatmul.mubr.msk.f32.vlgmr.msra.gmra.mrb[0].mxu1 %vm187_vm1, %v174_v20  ;;  %625 = vmatprep.subr.mxu0 %v851_v1  ;;  %p776_p8 = pneg %p775_p6  ;;  %p782_p3 = por %p781_p13, %p780_p10 }
  0x60   : > { %632 = vmatprep.mubr.msk.f32.mxu1 %vm850_vm0, %v851_v1 }
  0x61   : > { %598 = vmatmul.mubr.msk.f32.vlgmr.msra.gmra.mrb[0].mxu0 %vm187_vm1, %v174_v20  ;;  %p783_p7 = pnand %p782_p3, %p776_p8 }
  0x62   : > { %627 = vmatprep.mubr.msk.f32.mxu0 %vm850_vm0, %v851_v1 }
 0x132   : > { %v328_v21 = vpop.f32.mrb[0].mxu1 }
 0x133   : > { %v624_v22 = vpop.f32.mrb[1].mxu1  ;;  %626 = vmatpush3.xpose.msra.mxu0 %v328_v21 }
 0x134   : > { %v257_v23 = vpop.f32.mrb[0].mxu0 }
 0x135   : > { %v259_v24 = vpop.f32.mrb[1].mxu0  ;;  %631 = vmatpush3.msra.mxu1 %v257_v23 }
 0x136   : > { %628 = vmatmul.mubr.f32.vlgmr.msra.gmra.mrb[2].mxu0 %v259_v24 }
 0x209   : > { %v398_v28 = vpop.f32.mrb[2].mxu0 }
 0x20a   : > { %v407_v29 = vsel %vm406_vm2, %v398_v28, -inf  ;;  %v629_v30 = vpop.f32.mrb[3].mxu0 }
 0x20b   : > { %v409_v31 = vsel %vm408_vm3, %v407_v29, -inf }
 0x20c   : > { %410 = vmax.xlane.f32.xlu0 %v409_v31 }
 0x299   : > { %v411_v32 = vpop.xlane.xlu0 %410 }
 0x29a   : > { %v412_v33 = vsub.f32 %v407_v29, %v411_v32 }
 0x29c   : > { %v413_v34 = vmul.f32 1.442695, %v412_v33 }
 0x29e   : > { %711 = vpow2.f32 %v413_v34 }
 0x2a8   : > { %v712_v35 = vpop.eup %711 }
 0x2a9   : > { %v415_v36 = vsel %vm408_vm3, %v712_v35, 0.0 }
 0x2aa   : > { %416 = vadd.xlane.f32.xlu0 %v415_v36 }
 0x337   : > { %v417_v37 = vpop.xlane.xlu0 %416 }
 0x338   : > { %713 = vrcp.f32 %v417_v37 }
 0x342   : > { %v714_v38 = vpop.eup %713 }
 0x343   : > { %v419_v39 = vmul.f32 %v714_v38, %v712_v35 }
 0x345   : > { %633 = vmatmul.mubr.msk.f32.vlgmr.msra.gmra.mrb[2].mxu1 %vm408_vm3, %v419_v39 }
 0x418   : > { %v489_v40 = vpop.f32.mrb[2].mxu1 }
 0x419   : > { %493 = vst [vmem:[%s173_s15] sm:$0xff] %v489_v40  ;;  %v634_v41 = vpop.f32.mrb[3].mxu1 }
 0x41a   : > { %786 = shalt.err (!%p783_p7)
}
 0x41b   : > { %s787_s6 = scalar_lea.hbm %s1035_s28, 128  ;;  %s791_s24 = scalar_lea.hbm %s1079_s2, 256 }
 0x41c   : > { %p788_p9 = scmp.ne.s32.totalorder %s1035_s28, %s787_s6  ;;  %p792_p0 = scmp.lt.u32.totalorder %s1035_s28, %s1079_s2 }
 0x41d   : > { %p793_p11 = scmp.lt.u32.totalorder %s791_s24, %s787_s6  ;;  %p795_p4 = scmp.lt.u32.totalorder %s787_s6, %s1035_s28 }
 0x41e   : > { %p789_p2 = pnand %p788_p9, %p959_p12 }
 0x41f   : > { %p794_p1 = por %p793_p11, %p792_p0 }
 0x420   : > { %p790_p5 = pneg %p789_p2 }
 0x421   : > { %p796_p6 = por %p795_p4, %p794_p1 }
 0x423   : > { %p797_p8 = pnand %p796_p6, %p790_p5 }
 0x425   : > { %800 = shalt.err (!%p797_p8)
}
 0x426   : > { %655 = dma.vmem_to_hbm [thread:$0]  (%p959_p12), %s1030_s17, 128, %s1035_s28, %s495_s30  }
 0x427 PF: > { %s520_s26 = sand.u32 1, %s831_s9   ;;  %p1094_p10 = scmp.ne.s32.totalorder %s1084_s16, 0 }
 0x428   : > { %p1095_p13 = scmp.ge.s32.totalorder %s843_s12, 2  ;;  %s521_s19 = scalar_lea.sflag [#allocation4], %s520_s26 }
 0x42a   : > { %p666_p3 = pnand %p1095_p13, %p1094_p10 }
 0x42c   : > { %826 = dma.done.wait (!%p666_p3), %s521_s19, 128  }
 0x42d   : > { %828 = vsyncadd (!%p666_p3), %s521_s19, 4294967168  ;;  %p16_p7 = scmp.ge.s32.totalorder %s924_s21, 4   ;;  %s1096_s9 = smov %s835_s10 }
 0x42e   : > { %s1097_s10 = smov %s839_s11  ;;  %s1098_s11 = smov %s955_s8 }
 0x42f   : > { %s1099_s12 = smov %s924_s21  ;;  %18 = sbr.rel (!%p16_p7) target bundleno = 6 (0x6), region = 77 }
 0x436   :  { %526 = vsyncpa [#allocation3], 1 }
 0x437   :  { %528 = vsyncpa [#allocation3 + $0x1], 1 }
 0x438   :  { %529 = vsyncpa [#allocation6], 1 }
 0x439   :  { %530 = vsyncpa [#allocation4], 1 }
 0x43a   :  { %532 = vsyncpa [#allocation4 + $0x1], 1 }

</bundles_post_ra>
